<compile_context>
chip_gen: v7x
topology: tpu7x:2x2x1
jax: 0.10.0
libtpu: 0.0.40
codegen_flags: <defaults>
</compile_context>

<pallas_src>
import math

import jax
import jax.numpy as jnp
from jax import lax
from jax.experimental import pallas as pl
from jax.experimental.pallas import tpu as pltpu


def _round_up(x, m):
    return ((x + m - 1) // m) * m


# ---------------------------------------------------------------------------
# Pallas kernel: out(Co, M) = relu(W(Co, K) @ P(K, M) + b(Co, 1))
# ---------------------------------------------------------------------------
def _gemm_bias_relu_kernel(w_ref, p_ref, b_ref, o_ref):
    acc = jnp.dot(w_ref[...], p_ref[...], preferred_element_type=jnp.float32)
    o_ref[...] = jnp.maximum(acc + b_ref[...], 0.0).astype(o_ref.dtype)


def _choose_m_tiling(m):
    """Pick lane tile tm and padded extent mp (mp % tm == 0)."""
    if m % 128 == 0:
        for tm in (512, 256, 128):      # >=256 fills the 256-wide MXU (v6e/v7x)
            if m % tm == 0:
                return tm, m
    if m <= 1024:
        return m, m                     # single full-extent block (tiny layers)
    return 128, _round_up(m, 128)


def gemm_bias_relu(w, p, b):
    """w: (Co, K) bf16, p: (K, M) bf16, b: (Co, 1) f32 -> f32 relu(w @ p + b)."""
    co, kk = w.shape
    kk2, m = p.shape
    assert kk == kk2, (kk, kk2)
    tm, mp = _choose_m_tiling(m)
    if mp != m:
        # TODO(synk): mask the tail tile in-kernel instead of pad+slice
        # (never triggered at the shapes exercised here).
        p = jnp.pad(p, ((0, 0), (0, mp - m)))

    out = pl.pallas_call(
        _gemm_bias_relu_kernel,
        out_shape=jax.ShapeDtypeStruct((co, mp), jnp.float32),
        grid_spec=pltpu.PrefetchScalarGridSpec(
            num_scalar_prefetch=0,
            grid=(mp // tm,),
            in_specs=[
                pl.BlockSpec((co, kk), lambda i: (0, 0)),   # weights (resident)
                pl.BlockSpec((kk, tm), lambda i: (0, i)),   # patch tile, lane-dense
                pl.BlockSpec((co, 1), lambda i: (0, 0)),    # bias column
            ],
            out_specs=pl.BlockSpec((co, tm), lambda i: (0, i)),
        ),
        # Tiny grid (1-4 steps): keep it on one TensorCore (v7x advice).
        compiler_params=pltpu.CompilerParams(
            dimension_semantics=("arbitrary",)),
    )(w, p, b)
    return out if mp == m else out[:, :m]


# ---------------------------------------------------------------------------
# One-time parameter preparation (hoisted out of the forward path)
# ---------------------------------------------------------------------------
def _prep_conv(w, b, k, compute_dtype):
    """Encoder Conv2d weight (Cout, Cin, k, k) -> GEMM weight (Cout, Kp)."""
    cout, cin = w.shape[0], w.shape[1]
    kk = cin * k * k
    kp = _round_up(kk, 8)                      # sublane-aligned contraction dim
    wm = jnp.pad(w.reshape(cout, kk), ((0, 0), (0, kp - kk)))
    return dict(kind="conv", w=wm.astype(compute_dtype),
                b=b.reshape(cout, 1).astype(jnp.float32),
                k=k, cin=cin, cout=cout, K=kk, Kp=kp)


def _transposed_conv_phase_taps(k, stride=2):
    """Phase taps for ConvTranspose2d(stride) + ConvTranspose2dSamePad crop.

    For cropped output index o = stride*q + r, the contributing kernel taps p
    satisfy p % stride == (r + pad_lo) % stride and read input index q + d_p,
    with d_p = (r + pad_lo - p) // stride and pad_lo = (k - stride) // 2.
    """
    pad_lo = (k - stride) // 2
    taps = []
    for r in range(stride):
        taps.append([(p, (r + pad_lo - p) // stride)
                     for p in range(k) if (p % stride) == ((r + pad_lo) % stride)])
    return taps


def _prep_deconv(w, b, k, compute_dtype):
    """Decoder ConvTranspose2d weight (Cin, Cout, k, k) -> block GEMM weight.

    Output rows are ordered (phase major, Cout minor), phase = 2*rh + rw.
    """
    cin, cout = w.shape[0], w.shape[1]
    taps = _transposed_conv_phase_taps(k, 2)
    all_d = [d for tp in taps for (_, d) in tp]
    plo = max(0, -min(all_d))
    phi = max(0, max(all_d))

    wsubs, ks = [], []
    for rh in range(2):
        for rw in range(2):
            ph_idx = [p for (p, _) in taps[rh]]
            pw_idx = [p for (p, _) in taps[rw]]
            wsub = w[:, :, ph_idx, :][:, :, :, pw_idx]          # (Cin,Cout,th,tw)
            wsub = jnp.transpose(wsub, (1, 0, 2, 3)).reshape(cout, -1)
            wsubs.append(wsub)
            ks.append(wsub.shape[1])

    ktot = sum(ks)                                              # == Cin*k*k
    kp = _round_up(ktot, 8)
    wall = jnp.zeros((4 * cout, kp), jnp.float32)
    off = 0
    for phase, (wsub, kph) in enumerate(zip(wsubs, ks)):
        wall = wall.at[phase * cout:(phase + 1) * cout, off:off + kph].set(wsub)
        off += kph
    ball = jnp.tile(b.reshape(1, cout), (4, 1)).reshape(4 * cout, 1)
    return dict(kind="deconv", w=wall.astype(compute_dtype),
                b=ball.astype(jnp.float32),
                k=k, cin=cin, cout=cout, taps=taps, plo=plo, phi=phi, Kp=kp)


def prepare_conv_ae_params(params, kernels, compute_dtype=jnp.bfloat16):
    enc_ws, enc_bs, dec_ws, dec_bs = params
    layers = []
    for w, b, k in zip(enc_ws, enc_bs, kernels):
        layers.append(_prep_conv(w, b, k, compute_dtype))
    for w, b, k in zip(dec_ws, dec_bs, list(reversed(kernels))):
        layers.append(_prep_deconv(w, b, k, compute_dtype))
    return layers


# ---------------------------------------------------------------------------
# Per-layer forward (channel-major activations (C, N, H, W))
# ---------------------------------------------------------------------------
def _conv_layer(x, lyr):
    """Conv2dSamePad(k, 2) -> Conv2d(stride=2) -> ReLU."""
    c, n, h, w = x.shape
    assert c == lyr["cin"]
    k, s = lyr["k"], 2
    oh, ow = -(-h // s), -(-w // s)
    pad_h = (oh - 1) * s + k - h
    pad_w = (ow - 1) * s + k - w
    pt, plf = pad_h // 2, pad_w // 2
    xp = jnp.pad(x, ((0, 0), (0, 0), (pt, pad_h - pt), (plf, pad_w - plf)))
    blocks = [xp[:, :, i:i + s * (oh - 1) + 1:s, j:j + s * (ow - 1) + 1:s]
              for i in range(k) for j in range(k)]
    patches = jnp.stack(blocks, axis=1).reshape(c * k * k, n * oh * ow)
    if lyr["Kp"] != c * k * k:
        patches = jnp.pad(patches, ((0, lyr["Kp"] - c * k * k), (0, 0)))
    y = gemm_bias_relu(lyr["w"], patches.astype(lyr["w"].dtype), lyr["b"])
    return y.reshape(lyr["cout"], n, oh, ow)


def _deconv_layer(x, lyr):
    """ConvTranspose2d(stride=2) -> SamePad crop -> ReLU (phase decomposition)."""
    c, n, h, w = x.shape
    assert c == lyr["cin"]
    taps, plo, phi, cout = lyr["taps"], lyr["plo"], lyr["phi"], lyr["cout"]
    xp = jnp.pad(x, ((0, 0), (0, 0), (plo, phi), (plo, phi)))
    mats = []
    for rh in range(2):
        for rw in range(2):
            blocks = [xp[:, :, plo + dh:plo + dh + h, plo + dw:plo + dw + w]
                      for (_, dh) in taps[rh] for (_, dw) in taps[rw]]
            mats.append(jnp.stack(blocks, axis=1).reshape(c * len(blocks), n * h * w))
    patches = jnp.concatenate(mats, axis=0)
    if lyr["Kp"] != patches.shape[0]:
        patches = jnp.pad(patches, ((0, lyr["Kp"] - patches.shape[0]), (0, 0)))
    y = gemm_bias_relu(lyr["w"], patches.astype(lyr["w"].dtype), lyr["b"])
    # (4*Cout, N*H*W) -> interleave phases -> (Cout, N, 2H, 2W)
    y = y.reshape(2, 2, cout, n, h, w)
    y = jnp.transpose(y, (2, 3, 4, 0, 5, 1)).reshape(cout, n, 2 * h, 2 * w)
    return y


def conv_ae_forward(x_nchw, layers):
    x = jnp.transpose(x_nchw, (1, 0, 2, 3))      # NCHW -> channel-major (C,N,H,W)
    for lyr in layers:
        x = _conv_layer(x, lyr) if lyr["kind"] == "conv" else _deconv_layer(x, lyr)
    return jnp.transpose(x, (1, 0, 2, 3)).astype(jnp.float32)   # back to NCHW


# ---------------------------------------------------------------------------
# Parameter init (PyTorch-layout weights) and a pure-lax f32 reference
# ---------------------------------------------------------------------------
def init_conv_ae_params(key, channels, kernels):
    assert len(kernels) == len(channels) - 1
    enc_ws, enc_bs, dec_ws, dec_bs = [], [], [], []
    for i in range(1, len(channels)):
        key, kw_, kb_ = jax.random.split(key, 3)
        cin, cout, k = channels[i - 1], channels[i], kernels[i - 1]
        std = math.sqrt(2.0 / (cin * k * k))
        enc_ws.append(jax.random.normal(kw_, (cout, cin, k, k), jnp.float32) * std)
        enc_bs.append(jax.random.normal(kb_, (cout,), jnp.float32) * 0.01)
    rch, rks = list(reversed(channels)), list(reversed(kernels))
    for i in range(len(rch) - 1):
        key, kw_, kb_ = jax.random.split(key, 3)
        cin, cout, k = rch[i], rch[i + 1], rks[i]
        std = math.sqrt(2.0 / (cin * k * k))
        dec_ws.append(jax.random.normal(kw_, (cin, cout, k, k), jnp.float32) * std)
        dec_bs.append(jax.random.normal(kb_, (cout,), jnp.float32) * 0.01)
    return (enc_ws, enc_bs, dec_ws, dec_bs)


def reference_forward(x, params, kernels):
    """Straightforward f32 lax.conv reference (matches the PyTorch module)."""
    enc_ws, enc_bs, dec_ws, dec_bs = params
    s = 2
    h = x
    for w, b, k in zip(enc_ws, enc_bs, kernels):
        hh, ww = h.shape[2], h.shape[3]
        oh, ow = -(-hh // s), -(-ww // s)
        ph = (oh - 1) * s + k - hh
        pw = (ow - 1) * s + k - ww
        h = lax.conv_general_dilated(
            h, w, (s, s), ((ph // 2, ph - ph // 2), (pw // 2, pw - pw // 2)),
            dimension_numbers=("NCHW", "OIHW", "NCHW"),
            precision=lax.Precision.HIGHEST)
        h = jnp.maximum(h + b.reshape(1, -1, 1, 1), 0.0)
    for w, b, k in zip(dec_ws, dec_bs, list(reversed(kernels))):
        w_eq = jnp.flip(w, (2, 3)).transpose(1, 0, 2, 3)
        y = lax.conv_general_dilated(
            h, w_eq, (1, 1), ((k - 1, k - 1), (k - 1, k - 1)),
            lhs_dilation=(s, s),
            dimension_numbers=("NCHW", "OIHW", "NCHW"),
            precision=lax.Precision.HIGHEST)
        crop = k - s
        ct, cb = crop // 2, crop - crop // 2
        y = y[:, :, ct:y.shape[2] - cb, ct:y.shape[3] - cb]
        h = jnp.maximum(y + b.reshape(1, -1, 1, 1), 0.0)
    return h


if __name__ == "__main__":
    channels = [4, 8, 16]          # input channels 4, two encoder layers
    kernels = [3, 3]
    key = jax.random.PRNGKey(0)
    key, kx = jax.random.split(key)
    x = jax.random.normal(kx, (2, 4, 16, 16), jnp.float32)   # NCHW

    params = init_conv_ae_params(key, channels, kernels)
    layers = prepare_conv_ae_params(params, kernels, compute_dtype=jnp.bfloat16)

    fwd = jax.jit(lambda inp: conv_ae_forward(inp, layers))
    y = jax.block_until_ready(fwd(x))

    assert y.shape == (2, 4, 16, 16), y.shape
    assert y.dtype == jnp.float32
    assert bool(jnp.all(y >= 0.0))   # final decoder layer ends in ReLU

    # Numerical check against an f32 lax.conv reference (bf16-operand GEMMs
    # with f32 accumulation -> small tolerance).
    ref = jax.jit(lambda inp: reference_forward(inp, params, kernels))(x)
    max_err = float(jnp.max(jnp.abs(y - ref)))
    assert max_err < 0.2, f"mismatch vs f32 reference: {max_err}"

    print("KERNEL_OK")
</pallas_src>

<mosaic_0001>
module attributes {stable_mosaic.version = 11 : i64} {
  func.func @_gemm_bias_relu_kernel(%arg0: i32, %arg1: memref<8x40xbf16, #tpu.memory_space<vmem>>, %arg2: memref<40x128xbf16, #tpu.memory_space<vmem>>, %arg3: memref<8x1xf32, #tpu.memory_space<vmem>>, %arg4: memref<8x128xf32, #tpu.memory_space<vmem>>) attributes {dimension_semantics = [#tpu.dimension_semantics<arbitrary>], iteration_bounds = array<i64: 1>, scalar_prefetch = 0 : i64, scratch_operands = 0 : i64, tpu.core_type = #tpu.core_type<tc>, window_params = [{pipeline_mode = #tpu.pipeline_mode<synchronous>, transform_indices = @transform_0, window_bounds = array<i64: 8, 40>}, {transform_indices = @transform_1, window_bounds = array<i64: 40, 128>}, {pipeline_mode = #tpu.pipeline_mode<synchronous>, transform_indices = @transform_2, window_bounds = array<i64: 8, 1>}, {transform_indices = @transform_3, window_bounds = array<i64: 8, 128>}]} {
    %c0 = arith.constant 0 : index
    %c0_0 = arith.constant 0 : index
    %0 = vector.load %arg1[%c0, %c0_0] : memref<8x40xbf16, #tpu.memory_space<vmem>>, vector<8x40xbf16>
    %c0_1 = arith.constant 0 : index
    %c0_2 = arith.constant 0 : index
    %1 = vector.load %arg2[%c0_1, %c0_2] : memref<40x128xbf16, #tpu.memory_space<vmem>>, vector<40x128xbf16>
    %cst = arith.constant dense<0.000000e+00> : vector<8x128xf32>
    %2 = tpu.matmul %0, %1, %cst {dimension_numbers = #tpu.dot_dimension_numbers<[1], [0], [0], [1], [0, 0, 1, 1], [], []>} : vector<8x40xbf16>, vector<40x128xbf16>, vector<8x128xf32> -> vector<8x128xf32>
    %c0_3 = arith.constant 0 : index
    %c0_4 = arith.constant 0 : index
    %3 = vector.load %arg3[%c0_3, %c0_4] : memref<8x1xf32, #tpu.memory_space<vmem>>, vector<8x1xf32>
    %4 = vector.broadcast %3 : vector<8x1xf32> to vector<8x128xf32>
    %5 = arith.addf %2, %4 : vector<8x128xf32>
    %cst_5 = arith.constant 0.000000e+00 : f32
    %6 = vector.broadcast %cst_5 : f32 to vector<8x128xf32>
    %7 = arith.maximumf %5, %6 : vector<8x128xf32>
    %c0_6 = arith.constant 0 : index
    %c0_7 = arith.constant 0 : index
    %8 = vector.load %arg4[%c0_6, %c0_7] : memref<8x128xf32, #tpu.memory_space<vmem>>, vector<8x128xf32>
    tpu.vector_store %arg4[%c0_6, %c0_7], %7 {strides = array<i32>} : memref<8x128xf32, #tpu.memory_space<vmem>>, vector<8x128xf32>,
    return
  }
  func.func @transform_0(%arg0: i32) -> (i32, i32) {
    %c0_i32 = arith.constant 0 : i32
    %c0_i32_0 = arith.constant 0 : i32
    %c0_i32_1 = arith.constant 0 : i32
    return %c0_i32, %c0_i32_0 : i32, i32
  }
  func.func @transform_1(%arg0: i32) -> (i32, i32) {
    %c0_i32 = arith.constant 0 : i32
    %c0_i32_0 = arith.constant 0 : i32
    return %c0_i32, %arg0 : i32, i32
  }
  func.func @transform_2(%arg0: i32) -> (i32, i32) {
    %c0_i32 = arith.constant 0 : i32
    %c0_i32_0 = arith.constant 0 : i32
    %c0_i32_1 = arith.constant 0 : i32
    return %c0_i32, %c0_i32_0 : i32, i32
  }
  func.func @transform_3(%arg0: i32) -> (i32, i32) {
    %c0_i32 = arith.constant 0 : i32
    %c0_i32_0 = arith.constant 0 : i32
    return %c0_i32, %arg0 : i32, i32
  }
}

module attributes {stable_mosaic.version = 11 : i64} {
  func.func @_gemm_bias_relu_kernel(%arg0: i32, %arg1: memref<16x72xbf16, #tpu.memory_space<vmem>>, %arg2: memref<72x32xbf16, #tpu.memory_space<vmem>>, %arg3: memref<16x1xf32, #tpu.memory_space<vmem>>, %arg4: memref<16x32xf32, #tpu.memory_space<vmem>>) attributes {dimension_semantics = [#tpu.dimension_semantics<arbitrary>], iteration_bounds = array<i64: 1>, scalar_prefetch = 0 : i64, scratch_operands = 0 : i64, tpu.core_type = #tpu.core_type<tc>, window_params = [{pipeline_mode = #tpu.pipeline_mode<synchronous>, transform_indices = @transform_0, window_bounds = array<i64: 16, 72>}, {transform_indices = @transform_1, window_bounds = array<i64: 72, 32>}, {pipeline_mode = #tpu.pipeline_mode<synchronous>, transform_indices = @transform_2, window_bounds = array<i64: 16, 1>}, {transform_indices = @transform_3, window_bounds = array<i64: 16, 32>}]} {
    %c0 = arith.constant 0 : index
    %c0_0 = arith.constant 0 : index
    %0 = vector.load %arg1[%c0, %c0_0] : memref<16x72xbf16, #tpu.memory_space<vmem>>, vector<16x72xbf16>
    %c0_1 = arith.constant 0 : index
    %c0_2 = arith.constant 0 : index
    %1 = vector.load %arg2[%c0_1, %c0_2] : memref<72x32xbf16, #tpu.memory_space<vmem>>, vector<72x32xbf16>
    %cst = arith.constant dense<0.000000e+00> : vector<16x32xf32>
    %2 = tpu.matmul %0, %1, %cst {dimension_numbers = #tpu.dot_dimension_numbers<[1], [0], [0], [1], [0, 0, 1, 1], [], []>} : vector<16x72xbf16>, vector<72x32xbf16>, vector<16x32xf32> -> vector<16x32xf32>
    %c0_3 = arith.constant 0 : index
    %c0_4 = arith.constant 0 : index
    %3 = vector.load %arg3[%c0_3, %c0_4] : memref<16x1xf32, #tpu.memory_space<vmem>>, vector<16x1xf32>
    %4 = vector.broadcast %3 : vector<16x1xf32> to vector<16x32xf32>
    %5 = arith.addf %2, %4 : vector<16x32xf32>
    %cst_5 = arith.constant 0.000000e+00 : f32
    %6 = vector.broadcast %cst_5 : f32 to vector<16x32xf32>
    %7 = arith.maximumf %5, %6 : vector<16x32xf32>
    %c0_6 = arith.constant 0 : index
    %c0_7 = arith.constant 0 : index
    %8 = vector.load %arg4[%c0_6, %c0_7] : memref<16x32xf32, #tpu.memory_space<vmem>>, vector<16x32xf32>
    tpu.vector_store %arg4[%c0_6, %c0_7], %7 {strides = array<i32>} : memref<16x32xf32, #tpu.memory_space<vmem>>, vector<16x32xf32>,
    return
  }
  func.func @transform_0(%arg0: i32) -> (i32, i32) {
    %c0_i32 = arith.constant 0 : i32
    %c0_i32_0 = arith.constant 0 : i32
    %c0_i32_1 = arith.constant 0 : i32
    return %c0_i32, %c0_i32_0 : i32, i32
  }
  func.func @transform_1(%arg0: i32) -> (i32, i32) {
    %c0_i32 = arith.constant 0 : i32
    %c0_i32_0 = arith.constant 0 : i32
    return %c0_i32, %arg0 : i32, i32
  }
  func.func @transform_2(%arg0: i32) -> (i32, i32) {
    %c0_i32 = arith.constant 0 : i32
    %c0_i32_0 = arith.constant 0 : i32
    %c0_i32_1 = arith.constant 0 : i32
    return %c0_i32, %c0_i32_0 : i32, i32
  }
  func.func @transform_3(%arg0: i32) -> (i32, i32) {
    %c0_i32 = arith.constant 0 : i32
    %c0_i32_0 = arith.constant 0 : i32
    return %c0_i32, %arg0 : i32, i32
  }
}

module attributes {stable_mosaic.version = 11 : i64} {
  func.func @_gemm_bias_relu_kernel(%arg0: i32, %arg1: memref<32x144xbf16, #tpu.memory_space<vmem>>, %arg2: memref<144x32xbf16, #tpu.memory_space<vmem>>, %arg3: memref<32x1xf32, #tpu.memory_space<vmem>>, %arg4: memref<32x32xf32, #tpu.memory_space<vmem>>) attributes {dimension_semantics = [#tpu.dimension_semantics<arbitrary>], iteration_bounds = array<i64: 1>, scalar_prefetch = 0 : i64, scratch_operands = 0 : i64, tpu.core_type = #tpu.core_type<tc>, window_params = [{pipeline_mode = #tpu.pipeline_mode<synchronous>, transform_indices = @transform_0, window_bounds = array<i64: 32, 144>}, {transform_indices = @transform_1, window_bounds = array<i64: 144, 32>}, {pipeline_mode = #tpu.pipeline_mode<synchronous>, transform_indices = @transform_2, window_bounds = array<i64: 32, 1>}, {transform_indices = @transform_3, window_bounds = array<i64: 32, 32>}]} {
    %c0 = arith.constant 0 : index
    %c0_0 = arith.constant 0 : index
    %0 = vector.load %arg1[%c0, %c0_0] : memref<32x144xbf16, #tpu.memory_space<vmem>>, vector<32x144xbf16>
    %c0_1 = arith.constant 0 : index
    %c0_2 = arith.constant 0 : index
    %1 = vector.load %arg2[%c0_1, %c0_2] : memref<144x32xbf16, #tpu.memory_space<vmem>>, vector<144x32xbf16>
    %cst = arith.constant dense<0.000000e+00> : vector<32x32xf32>
    %2 = tpu.matmul %0, %1, %cst {dimension_numbers = #tpu.dot_dimension_numbers<[1], [0], [0], [1], [0, 0, 1, 1], [], []>} : vector<32x144xbf16>, vector<144x32xbf16>, vector<32x32xf32> -> vector<32x32xf32>
    %c0_3 = arith.constant 0 : index
    %c0_4 = arith.constant 0 : index
    %3 = vector.load %arg3[%c0_3, %c0_4] : memref<32x1xf32, #tpu.memory_space<vmem>>, vector<32x1xf32>
    %4 = vector.broadcast %3 : vector<32x1xf32> to vector<32x32xf32>
    %5 = arith.addf %2, %4 : vector<32x32xf32>
    %cst_5 = arith.constant 0.000000e+00 : f32
    %6 = vector.broadcast %cst_5 : f32 to vector<32x32xf32>
    %7 = arith.maximumf %5, %6 : vector<32x32xf32>
    %c0_6 = arith.constant 0 : index
    %c0_7 = arith.constant 0 : index
    %8 = vector.load %arg4[%c0_6, %c0_7] : memref<32x32xf32, #tpu.memory_space<vmem>>, vector<32x32xf32>
    tpu.vector_store %arg4[%c0_6, %c0_7], %7 {strides = array<i32>} : memref<32x32xf32, #tpu.memory_space<vmem>>, vector<32x32xf32>,
    return
  }
  func.func @transform_0(%arg0: i32) -> (i32, i32) {
    %c0_i32 = arith.constant 0 : i32
    %c0_i32_0 = arith.constant 0 : i32
    %c0_i32_1 = arith.constant 0 : i32
    return %c0_i32, %c0_i32_0 : i32, i32
  }
  func.func @transform_1(%arg0: i32) -> (i32, i32) {
    %c0_i32 = arith.constant 0 : i32
    %c0_i32_0 = arith.constant 0 : i32
    return %c0_i32, %arg0 : i32, i32
  }
  func.func @transform_2(%arg0: i32) -> (i32, i32) {
    %c0_i32 = arith.constant 0 : i32
    %c0_i32_0 = arith.constant 0 : i32
    %c0_i32_1 = arith.constant 0 : i32
    return %c0_i32, %c0_i32_0 : i32, i32
  }
  func.func @transform_3(%arg0: i32) -> (i32, i32) {
    %c0_i32 = arith.constant 0 : i32
    %c0_i32_0 = arith.constant 0 : i32
    return %c0_i32, %arg0 : i32, i32
  }
}

module attributes {stable_mosaic.version = 11 : i64} {
  func.func @_gemm_bias_relu_kernel(%arg0: i32, %arg1: memref<16x72xbf16, #tpu.memory_space<vmem>>, %arg2: memref<72x128xbf16, #tpu.memory_space<vmem>>, %arg3: memref<16x1xf32, #tpu.memory_space<vmem>>, %arg4: memref<16x128xf32, #tpu.memory_space<vmem>>) attributes {dimension_semantics = [#tpu.dimension_semantics<arbitrary>], iteration_bounds = array<i64: 1>, scalar_prefetch = 0 : i64, scratch_operands = 0 : i64, tpu.core_type = #tpu.core_type<tc>, window_params = [{pipeline_mode = #tpu.pipeline_mode<synchronous>, transform_indices = @transform_0, window_bounds = array<i64: 16, 72>}, {transform_indices = @transform_1, window_bounds = array<i64: 72, 128>}, {pipeline_mode = #tpu.pipeline_mode<synchronous>, transform_indices = @transform_2, window_bounds = array<i64: 16, 1>}, {transform_indices = @transform_3, window_bounds = array<i64: 16, 128>}]} {
    %c0 = arith.constant 0 : index
    %c0_0 = arith.constant 0 : index
    %0 = vector.load %arg1[%c0, %c0_0] : memref<16x72xbf16, #tpu.memory_space<vmem>>, vector<16x72xbf16>
    %c0_1 = arith.constant 0 : index
    %c0_2 = arith.constant 0 : index
    %1 = vector.load %arg2[%c0_1, %c0_2] : memref<72x128xbf16, #tpu.memory_space<vmem>>, vector<72x128xbf16>
    %cst = arith.constant dense<0.000000e+00> : vector<16x128xf32>
    %2 = tpu.matmul %0, %1, %cst {dimension_numbers = #tpu.dot_dimension_numbers<[1], [0], [0], [1], [0, 0, 1, 1], [], []>} : vector<16x72xbf16>, vector<72x128xbf16>, vector<16x128xf32> -> vector<16x128xf32>
    %c0_3 = arith.constant 0 : index
    %c0_4 = arith.constant 0 : index
    %3 = vector.load %arg3[%c0_3, %c0_4] : memref<16x1xf32, #tpu.memory_space<vmem>>, vector<16x1xf32>
    %4 = vector.broadcast %3 : vector<16x1xf32> to vector<16x128xf32>
    %5 = arith.addf %2, %4 : vector<16x128xf32>
    %cst_5 = arith.constant 0.000000e+00 : f32
    %6 = vector.broadcast %cst_5 : f32 to vector<16x128xf32>
    %7 = arith.maximumf %5, %6 : vector<16x128xf32>
    %c0_6 = arith.constant 0 : index
    %c0_7 = arith.constant 0 : index
    %8 = vector.load %arg4[%c0_6, %c0_7] : memref<16x128xf32, #tpu.memory_space<vmem>>, vector<16x128xf32>
    tpu.vector_store %arg4[%c0_6, %c0_7], %7 {strides = array<i32>} : memref<16x128xf32, #tpu.memory_space<vmem>>, vector<16x128xf32>,
    return
  }
  func.func @transform_0(%arg0: i32) -> (i32, i32) {
    %c0_i32 = arith.constant 0 : i32
    %c0_i32_0 = arith.constant 0 : i32
    %c0_i32_1 = arith.constant 0 : i32
    return %c0_i32, %c0_i32_0 : i32, i32
  }
  func.func @transform_1(%arg0: i32) -> (i32, i32) {
    %c0_i32 = arith.constant 0 : i32
    %c0_i32_0 = arith.constant 0 : i32
    return %c0_i32, %arg0 : i32, i32
  }
  func.func @transform_2(%arg0: i32) -> (i32, i32) {
    %c0_i32 = arith.constant 0 : i32
    %c0_i32_0 = arith.constant 0 : i32
    %c0_i32_1 = arith.constant 0 : i32
    return %c0_i32, %c0_i32_0 : i32, i32
  }
  func.func @transform_3(%arg0: i32) -> (i32, i32) {
    %c0_i32 = arith.constant 0 : i32
    %c0_i32_0 = arith.constant 0 : i32
    return %c0_i32, %arg0 : i32, i32
  }
}

</mosaic_0001>

<bundles_post_ra>
// kernel: _lambda_.4
= control target key start
LH: loop header
LB: loop body
LE: loop exit
PB: predicated region body
PF: predicated region fallthrough
CT: control target
= control target key end

     0   :  { %v121_v0 = vmov 0.0   ;;  %vm122_vm0 = vmmov 0   ;;  %v123_v2 = vmov 0   ;;  %vm46_vm1 = vcmask 1043456   ;;  %s162_s1 = inlined_call_operand.vmem [shape: bf16[40,128], index: 1, kind: input, shape index: {}]   ;;  %s163_s2 = inlined_call_operand.vmem [shape: f32[8,1], index: 2, kind: input, shape index: {}]   ;;  %s164_s0 = inlined_call_operand.vmem [shape: bf16[8,40], index: 0, kind: input, shape index: {}]   ;;  %s165_s3 = inlined_call_operand.vmem [shape: f32[8,128], index: 3, kind: output, shape index: {}]  }
   0x1   :  { %104 = vmatprep.subr.bf16.mxu0 %v121_v0  ;;  %v118_v1 = vld [vmem:[%s162_s1] sm:$0xff]   ;;  %110 = vmatprep.mubr.msk.bf16.mxu0 %vm122_vm0, %v121_v0  ;;  %v119_v3 = vld [vmem:[%s162_s1 + $0x8] sm:$0xff]   ;;  %v120_v4 = vld [vmem:[%s162_s1 + $0x10] ss:$0 sps:$4 sm:$0xff]   ;;  %vm42_vm2 = vcmask 326656  }
   0x2   :  { %117 = vset.pattern.permute.xlu0 %v123_v2  ;;  %105 = vmatpush3.bf16.msra.mxu0 %v118_v1  ;;  %v21_v5 = vld [vmem:[%s163_s2] sm:$0xff]  ;;  %v48_v6 = vsel %vm46_vm1, %v120_v4, 0 }
   0x3   :  { %106 = vmatprep.subr.bf16.mxu0 %v121_v0  ;;  %24 = vperm.xlu0 %117, %v21_v5   ;;  %v15_v7 = vld [vmem:[%s164_s0] sm:$0xf] }
   0x6   :  { %107 = vmatpush3.bf16.msra.mxu0 %v119_v3 }
   0x7   :  { %108 = vmatprep.subr.bf16.mxu0 %v121_v0 }
   0xa   :  { %109 = vmatpush3.bf16.msra.mxu0 %v48_v6 }
   0xd   :  { %111 = vmatmul.mubr.msk.bf16.vlgmr.msra.gmra.mrb[0].mxu0 %vm42_vm2, %v15_v7 }
  0x82   :  { %v25_v8 = vpop.permute.xlu0 %24 }
  0xe0   :  { %v84_v9 = vpop.f32.mrb[0].mxu0 }
  0xe1   :  { %v85_v10 = vadd.f32 %v84_v9, %v25_v8  ;;  %v112_v11 = vpop.f32.mrb[1].mxu0 }
  0xe2   :  { %v87_v12 = vpop.f32.mrb[2].mxu0 }
  0xe3   :  { %v90_v13 = vmax.f32 %v85_v10, 0.0  ;;  %v113_v14 = vpop.f32.mrb[3].mxu0 }
  0xe5   :  { %91 = vst [vmem:[%s165_s3] sm:$0xff] %v90_v13 }

// kernel: _lambda_.5
= control target key start
LH: loop header
LB: loop body
LE: loop exit
PB: predicated region body
PF: predicated region fallthrough
CT: control target
= control target key end

     0   :  { %v165_v0 = vmov 0.0   ;;  %vm166_vm0 = vmmov 0   ;;  %v167_v2 = vmov 0   ;;  %vm74_vm1 = vcmask 1043456   ;;  %s218_s1 = inlined_call_operand.vmem [shape: bf16[72,32], index: 1, kind: input, shape index: {}]   ;;  %s219_s2 = inlined_call_operand.vmem [shape: f32[16,1], index: 2, kind: input, shape index: {}]   ;;  %s220_s0 = inlined_call_operand.vmem [shape: bf16[16,72], index: 0, kind: input, shape index: {}]   ;;  %s221_s3 = inlined_call_operand.vmem [shape: f32[16,32], index: 3, kind: output, shape index: {}]  }
   0x1   :  { %141 = vmatprep.subr.bf16.mxu0 %v165_v0  ;;  %v159_v1 = vld [vmem:[%s218_s1] sm:$0xff]   ;;  %151 = vmatprep.mubr.msk.bf16.mxu0 %vm166_vm0, %v165_v0  ;;  %v160_v3 = vld [vmem:[%s218_s1 + $0x8] sm:$0xff]   ;;  %v161_v5 = vld [vmem:[%s218_s1 + $0x10] sm:$0xff]   ;;  %vm70_vm2 = vcmask 588800   ;;  %vm121_vm3 = vcmask 261120  }
   0x2   :  { %158 = vset.pattern.permute.xlu0 %v167_v2  ;;  %142 = vmatpush3.bf16.msra.mxu0 %v159_v1  ;;  %v26_v4 = vld [vmem:[%s219_s2] sm:$0xff]  ;;  %v27_v6 = vld [vmem:[%s219_s2 + $0x8] sm:$0xff]  ;;  %v162_v7 = vld [vmem:[%s218_s1 + $0x18] sm:$0xff]  }
   0x3   :  { %143 = vmatprep.subr.bf16.mxu0 %v165_v0  ;;  %30 = vperm.xlu0 %158, %v26_v4   ;;  %v163_v8 = vld [vmem:[%s218_s1 + $0x20] ss:$0 sps:$4 sm:$0xff]  }
   0x4   :  { %v76_v9 = vsel %vm74_vm1, %v163_v8, 0  ;;  %v164_v10 = vld [vmem:[%s220_s0] sm:$0xff]  }
   0x6   :  { %144 = vmatpush3.bf16.msra.mxu0 %v160_v3 }
   0x7   :  { %145 = vmatprep.subr.bf16.mxu0 %v165_v0  ;;  %35 = vperm.xlu0 %158, %v27_v6  }
   0xa   :  { %146 = vmatpush3.bf16.msra.mxu0 %v161_v5 }
   0xb   :  { %147 = vmatprep.subr.bf16.mxu0 %v165_v0 }
   0xe   :  { %148 = vmatpush3.bf16.msra.mxu0 %v162_v7 }
   0xf   :  { %149 = vmatprep.subr.bf16.mxu0 %v165_v0 }
  0x12   :  { %150 = vmatpush3.bf16.msra.mxu0 %v76_v9 }
  0x15   :  { %152 = vmatmul.mubr.msk.bf16.vlgmr.msra.gmra.mrb[0].mxu0 %vm70_vm2, %v164_v10 }
  0x82   :  { %v31_v11 = vpop.permute.xlu0 %30 }
  0x86   :  { %v36_v15 = vpop.permute.xlu0 %35 }
  0xe8   :  { %v112_v12 = vpop.f32.mrb[0].mxu0 }
  0xe9   :  { %v113_v13 = vadd.f32 %v112_v12, %v31_v11  ;;  %v153_v14 = vpop.f32.mrb[1].mxu0 }
  0xea   :  { %v115_v16 = vpop.f32.mrb[2].mxu0 }
  0xeb   :  { %v119_v17 = vmax.f32 %v113_v13, 0.0  ;;  %v116_v18 = vadd.f32 %v115_v16, %v36_v15  ;;  %v154_v19 = vpop.f32.mrb[3].mxu0 }
  0xed   :  { %122 = vst.msk [vmem:[%s221_s3] sm:$0xff] %vm121_vm3, %v119_v17  ;;  %v120_v20 = vmax.f32 %v116_v18, 0.0 }
  0xef   :  { %123 = vst.msk [vmem:[%s221_s3 + $0x8] sm:$0xff] %vm121_vm3, %v120_v20 }

// kernel: _lambda_.6
= control target key start
LH: loop header
LB: loop body
LE: loop exit
PB: predicated region body
PF: predicated region fallthrough
CT: control target
= control target key end

     0   :  { %v253_v0 = vmov 0   ;;  %vm133_vm0 = vcmask 130048   ;;  %vm193_vm1 = vcmask 261120   ;;  %s337_s1 = inlined_call_operand.vmem [shape: bf16[144,32], index: 1, kind: input, shape index: {}]   ;;  %s338_s0 = inlined_call_operand.vmem [shape: bf16[32,144], index: 0, kind: input, shape index: {}]   ;;  %s339_s2 = inlined_call_operand.vmem [shape: f32[32,1], index: 2, kind: input, shape index: {}]   ;;  %s340_s3 = inlined_call_operand.vmem [shape: f32[32,32], index: 3, kind: output, shape index: {}]  }
   0x1   :  { %140 = vmatprep.subr.bf16.mxu0 %v253_v0  ;;  %217 = vmatprep.subr.bf16.mxu1 %v253_v0  ;;  %v238_v1 = vld [vmem:[%s337_s1] sm:$0xff]   ;;  %v239_v2 = vld [vmem:[%s337_s1 + $0x8] sm:$0xff]   ;;  %v240_v3 = vld [vmem:[%s337_s1 + $0x10] sm:$0xff]  }
   0x2   :  { %237 = vset.pattern.permute.xlu1 %v253_v0  ;;  %236 = vset.pattern.permute.xlu0 %v253_v0  ;;  %v241_v4 = vld [vmem:[%s337_s1 + $0x18] sm:$0xff]   ;;  %v249_v5 = vld [vmem:[%s338_s0 + $0x4] ss:$8 sps:$4 sm:$0xff]   ;;  %v39_v7 = vld [vmem:[%s339_s2 + $0x10] sm:$0xff] }
   0x3   :  { %141 = vmatpush1.bf16.msra.mxu0 %v238_v1  ;;  %226 = vmatpush1.bf16.msra.mxu1 %v238_v1  ;;  %v252_v6 = vld [vmem:[%s338_s0 + $0x14] ss:$8 sps:$4 sm:$0xff]   ;;  %v37_v8 = vld [vmem:[%s339_s2] sm:$0xff]  ;;  %v38_v11 = vld [vmem:[%s339_s2 + $0x8] sm:$0xff] }
   0x4   :  { %142 = vmatprep.subr.bf16.mxu0 %v253_v0  ;;  %218 = vmatprep.subr.bf16.mxu1 %v253_v0  ;;  %v40_v9 = vld [vmem:[%s339_s2 + $0x18] sm:$0xff]  ;;  %v242_v10 = vld [vmem:[%s337_s1 + $0x20] sm:$0xff]   ;;  %v243_v12 = vld [vmem:[%s337_s1 + $0x28] sm:$0xff]  }
   0x5   :  { %215 = vmatprep.mubr.msk.bf16.mxu0 %vm133_vm0, %v249_v5  ;;  %53 = vperm.xlu1 %237, %v39_v7   ;;  %v244_v13 = vld [vmem:[%s337_s1 + $0x30] sm:$0xff]   ;;  %v245_v14 = vld [vmem:[%s337_s1 + $0x38] sm:$0xff]   ;;  %v246_v15 = vld [vmem:[%s337_s1 + $0x40] sm:$0xff]  }
   0x6   :  { %216 = vmatprep.mubr.msk.bf16.mxu1 %vm133_vm0, %v252_v6  ;;  %43 = vperm.xlu0 %236, %v37_v8   ;;  %v247_v16 = vld [vmem:[%s338_s0] ss:$8 sps:$4 sm:$0xff]   ;;  %v250_v17 = vld [vmem:[%s338_s0 + $0x10] ss:$8 sps:$4 sm:$0xff]  }
   0x7   :  { %143 = vmatpush1.bf16.msra.mxu0 %v239_v2  ;;  %227 = vmatpush1.bf16.msra.mxu1 %v239_v2 }
   0x8   :  { %144 = vmatprep.subr.bf16.mxu0 %v253_v0  ;;  %219 = vmatprep.subr.bf16.mxu1 %v253_v0 }
   0x9   :  { %58 = vperm.xlu1 %237, %v40_v9  }
   0xa   :  { %48 = vperm.xlu0 %236, %v38_v11  }
   0xb   :  { %145 = vmatpush1.bf16.msra.mxu0 %v240_v3  ;;  %228 = vmatpush1.bf16.msra.mxu1 %v240_v3 }
   0xc   :  { %146 = vmatprep.subr.bf16.mxu0 %v253_v0  ;;  %220 = vmatprep.subr.bf16.mxu1 %v253_v0 }
   0xf   :  { %147 = vmatpush1.bf16.msra.mxu0 %v241_v4  ;;  %229 = vmatpush1.bf16.msra.mxu1 %v241_v4 }
  0x10   :  { %148 = vmatprep.subr.bf16.mxu0 %v253_v0  ;;  %221 = vmatprep.subr.bf16.mxu1 %v253_v0 }
  0x13   :  { %149 = vmatpush1.bf16.msra.mxu0 %v242_v10  ;;  %230 = vmatpush1.bf16.msra.mxu1 %v242_v10 }
  0x14   :  { %150 = vmatprep.subr.bf16.mxu0 %v253_v0  ;;  %222 = vmatprep.subr.bf16.mxu1 %v253_v0 }
  0x17   :  { %151 = vmatpush1.bf16.msra.mxu0 %v243_v12  ;;  %231 = vmatpush1.bf16.msra.mxu1 %v243_v12 }
  0x18   :  { %152 = vmatprep.subr.bf16.mxu0 %v253_v0  ;;  %223 = vmatprep.subr.bf16.mxu1 %v253_v0 }
  0x1b   :  { %153 = vmatpush1.bf16.msra.mxu0 %v244_v13  ;;  %232 = vmatpush1.bf16.msra.mxu1 %v244_v13 }
  0x1c   :  { %154 = vmatprep.subr.bf16.mxu0 %v253_v0  ;;  %224 = vmatprep.subr.bf16.mxu1 %v253_v0 }
  0x1f   :  { %155 = vmatpush1.bf16.msra.mxu0 %v245_v14  ;;  %233 = vmatpush1.bf16.msra.mxu1 %v245_v14 }
  0x20   :  { %156 = vmatprep.subr.bf16.mxu0 %v253_v0  ;;  %225 = vmatprep.subr.bf16.mxu1 %v253_v0 }
  0x23   :  { %157 = vmatpush1.bf16.msra.mxu0 %v246_v15  ;;  %234 = vmatpush1.bf16.msra.mxu1 %v246_v15 }
  0x26   :  { %173 = vmatmul.mubr.bf16.vlgmr.msra.gmra.mrb[0].mxu0 %v247_v16  ;;  %181 = vmatmul.mubr.bf16.vlgmr.msra.gmra.mrb[0].mxu1 %v250_v17 }
  0x84   :  { %v54_v18 = vpop.permute.xlu1 %53 }
  0x85   :  { %v44_v19 = vpop.permute.xlu0 %43 }
  0x88   :  { %v59_v20 = vpop.permute.xlu1 %58 }
  0x89   :  { %v49_v21 = vpop.permute.xlu0 %48 }
  0xf9   :  { %v174_v22 = vpop.f32.mrb[0].mxu0  ;;  %v182_v23 = vpop.f32.mrb[0].mxu1 }
  0xfa   :  { %v175_v24 = vadd.f32 %v174_v22, %v44_v19  ;;  %v183_v25 = vadd.f32 %v182_v23, %v54_v18  ;;  %v176_v26 = vpop.f32.mrb[1].mxu0  ;;  %v184_v27 = vpop.f32.mrb[1].mxu1 }
  0xfb   :  { %v177_v28 = vpop.f32.mrb[2].mxu0  ;;  %v185_v29 = vpop.f32.mrb[2].mxu1 }
  0xfc   :  { %v189_v30 = vmax.f32 %v175_v24, 0.0  ;;  %v191_v31 = vmax.f32 %v183_v25, 0.0  ;;  %v178_v32 = vadd.f32 %v177_v28, %v49_v21  ;;  %v186_v33 = vadd.f32 %v185_v29, %v59_v20  ;;  %v179_v34 = vpop.f32.mrb[3].mxu0  ;;  %v187_v35 = vpop.f32.mrb[3].mxu1 }
  0xfe   :  { %194 = vst.msk [vmem:[%s340_s3] sm:$0xff] %vm193_vm1, %v189_v30  ;;  %196 = vst.msk [vmem:[%s340_s3 + $0x10] sm:$0xff] %vm193_vm1, %v191_v31  ;;  %v190_v36 = vmax.f32 %v178_v32, 0.0  ;;  %v192_v37 = vmax.f32 %v186_v33, 0.0 }
 0x100   :  { %195 = vst.msk [vmem:[%s340_s3 + $0x8] sm:$0xff] %vm193_vm1, %v190_v36  ;;  %197 = vst.msk [vmem:[%s340_s3 + $0x18] sm:$0xff] %vm193_vm1, %v192_v37 }

// kernel: _lambda_.7
= control target key start
LH: loop header
LB: loop body
LE: loop exit
PB: predicated region body
PF: predicated region fallthrough
CT: control target
= control target key end

     0   :  { %v164_v0 = vmov 0.0   ;;  %vm165_vm0 = vmmov 0   ;;  %v166_v2 = vmov 0   ;;  %vm74_vm1 = vcmask 1043456   ;;  %s217_s1 = inlined_call_operand.vmem [shape: bf16[72,128], index: 1, kind: input, shape index: {}]   ;;  %s218_s2 = inlined_call_operand.vmem [shape: f32[16,1], index: 2, kind: input, shape index: {}]   ;;  %s219_s0 = inlined_call_operand.vmem [shape: bf16[16,72], index: 0, kind: input, shape index: {}]   ;;  %s220_s3 = inlined_call_operand.vmem [shape: f32[16,128], index: 3, kind: output, shape index: {}]  }
   0x1   :  { %140 = vmatprep.subr.bf16.mxu0 %v164_v0  ;;  %v158_v1 = vld [vmem:[%s217_s1] sm:$0xff]   ;;  %150 = vmatprep.mubr.msk.bf16.mxu0 %vm165_vm0, %v164_v0  ;;  %v159_v3 = vld [vmem:[%s217_s1 + $0x8] sm:$0xff]   ;;  %v160_v5 = vld [vmem:[%s217_s1 + $0x10] sm:$0xff]   ;;  %vm70_vm2 = vcmask 588800  }
   0x2   :  { %157 = vset.pattern.permute.xlu0 %v166_v2  ;;  %141 = vmatpush3.bf16.msra.mxu0 %v158_v1  ;;  %v26_v4 = vld [vmem:[%s218_s2] sm:$0xff]  ;;  %v27_v6 = vld [vmem:[%s218_s2 + $0x8] sm:$0xff]  ;;  %v161_v7 = vld [vmem:[%s217_s1 + $0x18] sm:$0xff]  }
   0x3   :  { %142 = vmatprep.subr.bf16.mxu0 %v164_v0  ;;  %30 = vperm.xlu0 %157, %v26_v4   ;;  %v162_v8 = vld [vmem:[%s217_s1 + $0x20] ss:$0 sps:$4 sm:$0xff]  }
   0x4   :  { %v76_v9 = vsel %vm74_vm1, %v162_v8, 0  ;;  %v163_v10 = vld [vmem:[%s219_s0] sm:$0xff]  }
   0x6   :  { %143 = vmatpush3.bf16.msra.mxu0 %v159_v3 }
   0x7   :  { %144 = vmatprep.subr.bf16.mxu0 %v164_v0  ;;  %35 = vperm.xlu0 %157, %v27_v6  }
   0xa   :  { %145 = vmatpush3.bf16.msra.mxu0 %v160_v5 }
   0xb   :  { %146 = vmatprep.subr.bf16.mxu0 %v164_v0 }
   0xe   :  { %147 = vmatpush3.bf16.msra.mxu0 %v161_v7 }
   0xf   :  { %148 = vmatprep.subr.bf16.mxu0 %v164_v0 }
  0x12   :  { %149 = vmatpush3.bf16.msra.mxu0 %v76_v9 }
  0x15   :  { %151 = vmatmul.mubr.msk.bf16.vlgmr.msra.gmra.mrb[0].mxu0 %vm70_vm2, %v163_v10 }
  0x82   :  { %v31_v11 = vpop.permute.xlu0 %30 }
  0x86   :  { %v36_v15 = vpop.permute.xlu0 %35 }
  0xe8   :  { %v112_v12 = vpop.f32.mrb[0].mxu0 }
  0xe9   :  { %v113_v13 = vadd.f32 %v112_v12, %v31_v11  ;;  %v152_v14 = vpop.f32.mrb[1].mxu0 }
  0xea   :  { %v115_v16 = vpop.f32.mrb[2].mxu0 }
  0xeb   :  { %v119_v17 = vmax.f32 %v113_v13, 0.0  ;;  %v116_v18 = vadd.f32 %v115_v16, %v36_v15  ;;  %v153_v19 = vpop.f32.mrb[3].mxu0 }
  0xed   :  { %121 = vst [vmem:[%s220_s3] sm:$0xff] %v119_v17  ;;  %v120_v20 = vmax.f32 %v116_v18, 0.0 }
  0xef   :  { %122 = vst [vmem:[%s220_s3 + $0x8] sm:$0xff] %v120_v20 }

</bundles_post_ra>
